<compile_context>
chip_gen: v7x
topology: tpu7x:2x2x1
jax: 0.10.0
libtpu: 0.0.40
codegen_flags: <defaults>
</compile_context>

<pallas_src>
import jax
import jax.numpy as jnp
from jax.experimental import pallas as pl
from jax.experimental.pallas import tpu as pltpu


# Model dimensions implied by the module: fc1 expects 16*5 features, so H*W == 5.
HW = 5                     # spatial pixels per sample (H*W)
C1, C2 = 6, 16             # conv1 / conv2 output channels
D1, D2, D3 = 40, 20, 10    # fc1 / fc2 / fc3 output features

# Augmented (bias-folded) matmul shapes: each layer is W_aug @ H with H carrying a
# trailing "ones" row so the bias rides along inside the matmul.
NA,  KA  = C1 * HW + 1, HW + 1        # (31, 6)   conv1 spread (per-pixel) + bias col
NBD, KBD = C2 * HW + 1, C1 * HW + 1   # (81, 31)  block-diagonal conv2 (torch-flatten rows)
N1,  K1  = D1 + 1,      C2 * HW + 1   # (41, 81)  fc1^T + bias col
N2,  K2  = D2 + 1,      D1 + 1        # (21, 41)  fc2^T + bias col
N3,  K3  = D3,          D2 + 1        # (10, 21)  fc3^T + bias col (no ones row needed)


def _align8(n):
    return ((n + 7) // 8) * 8


# Row offsets of each augmented weight inside the single packed slab (8-aligned).
R_A   = 0
R_BD  = R_A   + _align8(NA)     # 32
R_FC1 = R_BD  + _align8(NBD)    # 120
R_FC2 = R_FC1 + _align8(N1)     # 168
R_FC3 = R_FC2 + _align8(N2)     # 192
SLAB_ROWS = R_FC3 + _align8(N3)  # 208
SLAB_COLS = 128                  # max K is 81 -> one lane tile wide


# ----------------------------------------------------------------------------
# Fused kernel: conv1 -> conv2 -> flatten -> fc1 -> fc2 -> fc3 (all in VMEM)
# ----------------------------------------------------------------------------
def fused_net_kernel(x_ref, w_ref, o_ref):
    # x_ref: (6, bn)   rows 0..4 = pixels (torch order), row 5 = ones (bias carrier)
    # w_ref: (208, 128) packed slab of the five augmented weight matrices
    # o_ref: (10, bn)  lane-dense output (batch on lanes)
    f32 = jnp.float32

    wa  = w_ref[R_A:R_A + NA,     0:KA]     # (31, 6)
    wbd = w_ref[R_BD:R_BD + NBD,  0:KBD]    # (81, 31)
    w1  = w_ref[R_FC1:R_FC1 + N1, 0:K1]     # (41, 81)
    w2  = w_ref[R_FC2:R_FC2 + N2, 0:K2]     # (21, 41)
    w3  = w_ref[R_FC3:R_FC3 + N3, 0:K3]     # (10, 21)

    h = x_ref[...]                                                        # (6,  bn)
    h = jnp.maximum(jnp.dot(wa,  h, preferred_element_type=f32), 0.0)     # (31, bn) relu(conv1)
    h = jnp.maximum(jnp.dot(wbd, h, preferred_element_type=f32), 0.0)     # (81, bn) relu(conv2), flattened
    h = jnp.maximum(jnp.dot(w1,  h, preferred_element_type=f32), 0.0)     # (41, bn) relu(fc1)
    h = jnp.maximum(jnp.dot(w2,  h, preferred_element_type=f32), 0.0)     # (21, bn) relu(fc2)
    o_ref[...] = jnp.dot(w3, h, preferred_element_type=f32)               # (10, bn) fc3


# ----------------------------------------------------------------------------
# Wrapper
# ----------------------------------------------------------------------------
def _choose_block_n(n):
    """Batch (lane-axis) block size.

    Small batches: a single whole-array block.  Larger batches: a multiple of 128
    lanes, at least 2 grid steps (so v7x's 2 TensorCores both run), capped at 8192
    lanes (x block = 192 KiB, out block = 320 KiB -> trivially fits v7x VMEM even
    double-buffered)."""
    if n <= 256:
        return n
    half = -(-n // 2)                     # cdiv(n, 2): guarantees >= 2 grid steps
    block = min(8192, half)
    return -(-block // 128) * 128         # round up to a lane-tile multiple


def net_forward(x_nchw, w_slab):
    # x_nchw: (N, 1, H, W) with H*W == 5; w_slab: packed weights from prepare_kernel_params.
    N, C, H, W = x_nchw.shape
    assert C == 1 and H * W == HW

    # Channel dim is 1, so reshape keeps torch's h*W + w pixel order; transpose puts
    # batch on the lane axis.  Append the ones row that carries all biases.
    xt = x_nchw.reshape(N, HW).T.astype(jnp.float32)                   # (5, N)
    x_aug = jnp.concatenate([xt, jnp.ones((1, N), jnp.float32)], 0)    # (6, N)

    block_n = _choose_block_n(N)
    grid = (pl.cdiv(N, block_n),)

    flops = 2 * N * (NA * KA + NBD * KBD + N1 * K1 + N2 * K2 + N3 * K3)
    bytes_accessed = N * (HW + 1 + D3) * 4 + SLAB_ROWS * SLAB_COLS * 4

    out_t = pl.pallas_call(
        fused_net_kernel,
        out_shape=jax.ShapeDtypeStruct((D3, N), jnp.float32),
        grid=grid,
        in_specs=[
            pl.BlockSpec((HW + 1, block_n), lambda i: (0, i)),          # x (batch on lanes)
            pl.BlockSpec((SLAB_ROWS, SLAB_COLS), lambda i: (0, 0)),     # packed weight slab
        ],
        out_specs=pl.BlockSpec((D3, block_n), lambda i: (0, i)),
        compiler_params=pltpu.CompilerParams(
            dimension_semantics=("parallel",)),
        cost_estimate=pl.CostEstimate(
            flops=flops, transcendentals=0, bytes_accessed=bytes_accessed),
    )(x_aug, w_slab)

    return out_t.T                                                      # (N, 10)


def prepare_kernel_params(p):
    """One-time host-side prep: fold conv1, conv2, the (C,H,W) flatten permutation and
    ALL biases into five augmented matmul matrices, packed into one (208,128) slab."""
    f32 = jnp.float32
    w1 = p["conv1_w"].reshape(C1).astype(f32)
    b1 = p["conv1_b"].reshape(C1).astype(f32)
    w2 = p["conv2_w"].astype(f32)                    # (6, 16) stored (in, out)
    b2 = p["conv2_b"].reshape(C2).astype(f32)

    # Layer A: conv1 (Cin=1) folded into a per-pixel spread matrix.  Output row
    # j = p*6 + c1 ; last column is the bias carrier ; last row propagates the ones.
    wa = jnp.zeros((NA, KA), f32)
    for pix in range(HW):
        wa = wa.at[pix * C1:(pix + 1) * C1, pix].set(w1)
        wa = wa.at[pix * C1:(pix + 1) * C1, HW].set(b1)
    wa = wa.at[NA - 1, KA - 1].set(1.0)

    # Layer BD: block-diagonal conv2; output row k = c2*5 + p is already the torch
    # flatten order, so no in-kernel permutation is ever needed.
    wbd = jnp.zeros((NBD, KBD), f32)
    for pix in range(HW):
        wbd = wbd.at[pix:C2 * HW:HW, pix * C1:(pix + 1) * C1].set(w2.T)   # (16, 6)
        wbd = wbd.at[pix:C2 * HW:HW, C1 * HW].set(b2)
    wbd = wbd.at[NBD - 1, KBD - 1].set(1.0)

    # FC layers: transposed weights with bias column (+ ones row for fc1/fc2).
    wf1 = jnp.zeros((N1, K1), f32)
    wf1 = wf1.at[:D1, :C2 * HW].set(p["fc1_w"].T.astype(f32))
    wf1 = wf1.at[:D1, C2 * HW].set(p["fc1_b"].reshape(D1).astype(f32))
    wf1 = wf1.at[D1, C2 * HW].set(1.0)

    wf2 = jnp.zeros((N2, K2), f32)
    wf2 = wf2.at[:D2, :D1].set(p["fc2_w"].T.astype(f32))
    wf2 = wf2.at[:D2, D1].set(p["fc2_b"].reshape(D2).astype(f32))
    wf2 = wf2.at[D2, D1].set(1.0)

    wf3 = jnp.zeros((N3, K3), f32)
    wf3 = wf3.at[:, :D2].set(p["fc3_w"].T.astype(f32))
    wf3 = wf3.at[:, D2].set(p["fc3_b"].reshape(D3).astype(f32))

    # Pack everything into a single pre-padded f32 slab -> one weight DMA per launch.
    slab = jnp.zeros((SLAB_ROWS, SLAB_COLS), f32)
    slab = slab.at[R_A:R_A + NA, :KA].set(wa)
    slab = slab.at[R_BD:R_BD + NBD, :KBD].set(wbd)
    slab = slab.at[R_FC1:R_FC1 + N1, :K1].set(wf1)
    slab = slab.at[R_FC2:R_FC2 + N2, :K2].set(wf2)
    slab = slab.at[R_FC3:R_FC3 + N3, :K3].set(wf3)
    return slab


# ----------------------------------------------------------------------------
# Plain-JAX reference (literal PyTorch semantics) for correctness checking.
# ----------------------------------------------------------------------------
def net_forward_ref(x_nchw, p):
    N, C, H, W = x_nchw.shape
    x = jnp.transpose(x_nchw, (0, 2, 3, 1)).reshape(N * H * W, C)
    x = jnp.maximum(x @ p["conv1_w"] + p["conv1_b"], 0.0)
    x = jnp.maximum(x @ p["conv2_w"] + p["conv2_b"], 0.0)
    x = jnp.transpose(x.reshape(N, H, W, C2), (0, 3, 1, 2)).reshape(N, C2 * H * W)
    x = jnp.maximum(x @ p["fc1_w"] + p["fc1_b"], 0.0)
    x = jnp.maximum(x @ p["fc2_w"] + p["fc2_b"], 0.0)
    return x @ p["fc3_w"] + p["fc3_b"]


def init_params(key):
    # Deterministic synthetic parameters (same shapes as the torch module).
    ks = jax.random.split(key, 10)
    f32 = jnp.float32

    def u(k, shape, scale):
        return jax.random.uniform(k, shape, f32, -scale, scale)

    return {
        # conv weights stored as (Cin, Cout) matmul matrices (1x1 kernels).
        "conv1_w": u(ks[0], (1, C1), 1.0),
        "conv1_b": u(ks[1], (1, C1), 1.0),
        "conv2_w": u(ks[2], (C1, C2), 1.0 / C1 ** 0.5),
        "conv2_b": u(ks[3], (1, C2), 1.0 / C1 ** 0.5),
        # fc weights stored transposed (in_features, out_features), torch flatten order.
        "fc1_w": u(ks[4], (C2 * HW, D1), 1.0 / (C2 * HW) ** 0.5),
        "fc1_b": u(ks[5], (1, D1), 1.0 / (C2 * HW) ** 0.5),
        "fc2_w": u(ks[6], (D1, D2), 1.0 / D1 ** 0.5),
        "fc2_b": u(ks[7], (1, D2), 1.0 / D1 ** 0.5),
        "fc3_w": u(ks[8], (D2, D3), 1.0 / D2 ** 0.5),
        "fc3_b": u(ks[9], (1, D3), 1.0 / D2 ** 0.5),
    }


if __name__ == "__main__":
    key = jax.random.PRNGKey(0)
    k_x, k_p, k_x2 = jax.random.split(key, 3)

    params = init_params(k_p)
    w_slab = prepare_kernel_params(params)     # one-time weight folding/packing
    fwd = jax.jit(net_forward)

    # Small demo batch (NCHW, H*W == 5 as required by fc1's 16*5 input features).
    x_small = jax.random.uniform(k_x, (2, 1, 1, 5), jnp.float32)
    out_small = jax.block_until_ready(fwd(x_small, w_slab))
    ref_small = net_forward_ref(x_small, params)
    assert out_small.shape == (2, D3)
    assert jnp.allclose(out_small, ref_small, atol=1e-5, rtol=1e-5), \
        "Pallas output mismatch vs reference (small batch)"

    # Non-multiple-of-block batch: exercises the lane-blocked multi-step grid and the
    # masked writeback on the ragged last block (review's explicit correctness ask).
    x_big = jax.random.uniform(k_x2, (700, 1, 1, 5), jnp.float32)
    out_big = jax.block_until_ready(fwd(x_big, w_slab))
    ref_big = net_forward_ref(x_big, params)
    assert out_big.shape == (700, D3)
    assert jnp.allclose(out_big, ref_big, atol=1e-4, rtol=1e-4), \
        "Pallas output mismatch vs reference (large batch)"

    print("KERNEL_OK")
</pallas_src>

<mosaic_0001>
module attributes {stable_mosaic.version = 11 : i64} {
  func.func @fused_net_kernel(%arg0: i32, %arg1: memref<6x2xf32, #tpu.memory_space<vmem>>, %arg2: memref<208x128xf32, #tpu.memory_space<vmem>>, %arg3: memref<10x2xf32, #tpu.memory_space<vmem>>) attributes {dimension_semantics = [#tpu.dimension_semantics<parallel>], iteration_bounds = array<i64: 1>, scalar_prefetch = 0 : i64, scratch_operands = 0 : i64, tpu.core_type = #tpu.core_type<tc>, window_params = [{transform_indices = @transform_0, window_bounds = array<i64: 6, 2>}, {pipeline_mode = #tpu.pipeline_mode<synchronous>, transform_indices = @transform_1, window_bounds = array<i64: 208, 128>}, {transform_indices = @transform_2, window_bounds = array<i64: 10, 2>}]} {
    %c0 = arith.constant 0 : index
    %c0_0 = arith.constant 0 : index
    %0 = vector.load %arg2[%c0, %c0_0] : memref<208x128xf32, #tpu.memory_space<vmem>>, vector<31x6xf32>
    %c32 = arith.constant 32 : index
    %c0_1 = arith.constant 0 : index
    %1 = vector.load %arg2[%c32, %c0_1] : memref<208x128xf32, #tpu.memory_space<vmem>>, vector<81x31xf32>
    %c120 = arith.constant 120 : index
    %c0_2 = arith.constant 0 : index
    %2 = vector.load %arg2[%c120, %c0_2] : memref<208x128xf32, #tpu.memory_space<vmem>>, vector<41x81xf32>
    %c168 = arith.constant 168 : index
    %c0_3 = arith.constant 0 : index
    %3 = vector.load %arg2[%c168, %c0_3] : memref<208x128xf32, #tpu.memory_space<vmem>>, vector<21x41xf32>
    %c192 = arith.constant 192 : index
    %c0_4 = arith.constant 0 : index
    %4 = vector.load %arg2[%c192, %c0_4] : memref<208x128xf32, #tpu.memory_space<vmem>>, vector<10x21xf32>
    %c0_5 = arith.constant 0 : index
    %c0_6 = arith.constant 0 : index
    %5 = vector.load %arg1[%c0_5, %c0_6] : memref<6x2xf32, #tpu.memory_space<vmem>>, vector<6x2xf32>
    %cst = arith.constant dense<0.000000e+00> : vector<31x2xf32>
    %6 = tpu.matmul %0, %5, %cst {dimension_numbers = #tpu.dot_dimension_numbers<[1], [0], [0], [1], [0, 0, 1, 1], [], []>} : vector<31x6xf32>, vector<6x2xf32>, vector<31x2xf32> -> vector<31x2xf32>
    %cst_7 = arith.constant 0.000000e+00 : f32
    %7 = vector.broadcast %cst_7 : f32 to vector<31x2xf32>
    %8 = arith.maximumf %6, %7 : vector<31x2xf32>
    %cst_8 = arith.constant dense<0.000000e+00> : vector<81x2xf32>
    %9 = tpu.matmul %1, %8, %cst_8 {dimension_numbers = #tpu.dot_dimension_numbers<[1], [0], [0], [1], [0, 0, 1, 1], [], []>} : vector<81x31xf32>, vector<31x2xf32>, vector<81x2xf32> -> vector<81x2xf32>
    %cst_9 = arith.constant 0.000000e+00 : f32
    %10 = vector.broadcast %cst_9 : f32 to vector<81x2xf32>
    %11 = arith.maximumf %9, %10 : vector<81x2xf32>
    %cst_10 = arith.constant dense<0.000000e+00> : vector<41x2xf32>
    %12 = tpu.matmul %2, %11, %cst_10 {dimension_numbers = #tpu.dot_dimension_numbers<[1], [0], [0], [1], [0, 0, 1, 1], [], []>} : vector<41x81xf32>, vector<81x2xf32>, vector<41x2xf32> -> vector<41x2xf32>
    %cst_11 = arith.constant 0.000000e+00 : f32
    %13 = vector.broadcast %cst_11 : f32 to vector<41x2xf32>
    %14 = arith.maximumf %12, %13 : vector<41x2xf32>
    %cst_12 = arith.constant dense<0.000000e+00> : vector<21x2xf32>
    %15 = tpu.matmul %3, %14, %cst_12 {dimension_numbers = #tpu.dot_dimension_numbers<[1], [0], [0], [1], [0, 0, 1, 1], [], []>} : vector<21x41xf32>, vector<41x2xf32>, vector<21x2xf32> -> vector<21x2xf32>
    %cst_13 = arith.constant 0.000000e+00 : f32
    %16 = vector.broadcast %cst_13 : f32 to vector<21x2xf32>
    %17 = arith.maximumf %15, %16 : vector<21x2xf32>
    %cst_14 = arith.constant dense<0.000000e+00> : vector<10x2xf32>
    %18 = tpu.matmul %4, %17, %cst_14 {dimension_numbers = #tpu.dot_dimension_numbers<[1], [0], [0], [1], [0, 0, 1, 1], [], []>} : vector<10x21xf32>, vector<21x2xf32>, vector<10x2xf32> -> vector<10x2xf32>
    %c0_15 = arith.constant 0 : index
    %c0_16 = arith.constant 0 : index
    %19 = vector.load %arg3[%c0_15, %c0_16] : memref<10x2xf32, #tpu.memory_space<vmem>>, vector<10x2xf32>
    tpu.vector_store %arg3[%c0_15, %c0_16], %18 {strides = array<i32>} : memref<10x2xf32, #tpu.memory_space<vmem>>, vector<10x2xf32>,
    return
  }
  func.func @transform_0(%arg0: i32) -> (i32, i32) {
    %c0_i32 = arith.constant 0 : i32
    %c0_i32_0 = arith.constant 0 : i32
    return %c0_i32, %arg0 : i32, i32
  }
  func.func @transform_1(%arg0: i32) -> (i32, i32) {
    %c0_i32 = arith.constant 0 : i32
    %c0_i32_0 = arith.constant 0 : i32
    %c0_i32_1 = arith.constant 0 : i32
    return %c0_i32, %c0_i32_0 : i32, i32
  }
  func.func @transform_2(%arg0: i32) -> (i32, i32) {
    %c0_i32 = arith.constant 0 : i32
    %c0_i32_0 = arith.constant 0 : i32
    return %c0_i32, %arg0 : i32, i32
  }
}

</mosaic_0001>

<bundles_post_ra>
// kernel: net_forward.1
= control target key start
LH: loop header
LB: loop body
LE: loop exit
PB: predicated region body
PF: predicated region fallthrough
CT: control target
= control target key end

     0   :  { %7 = vsyncpa [#allocation3], 0  ;;  %s906_s9 = smov [#allocation2]   ;;  %s1006_s0 = inlined_call_operand.vmem [shape: f32[6,2], index: 0, kind: input, shape index: {}]   ;;  %s1007_s1 = inlined_call_operand.hbm [shape: f32[208,128], index: 1, kind: input, shape index: {}]   ;;  %s1008_s2 = inlined_call_operand.vmem [shape: f32[10,2], index: 2, kind: output, shape index: {}]  }
   0x1   :  { %s15_s10 = sshll.u32 %s906_s9, 4  ;;  %s882_s13 = scalar_lea.hbm %s1007_s1, 3328  ;;  %s16_s10 = int_to_ptr.vmem [resolvable:$true] %s15_s10 }
   0x2   :  { %p883_p0 = scmp.ne.s32.totalorder %s1007_s1, %s882_s13  ;;  %p886_p1 = scmp.lt.u32.totalorder %s882_s13, %s1007_s1 }
   0x4   :  { %p888_p2 = pnand %p886_p1, %p883_p0 }
   0x6   :  { %891 = shalt.err (!%p888_p2)
}
   0x7   :  { %s892_s18 = scalar_lea.vmem %s16_s10, 3328  ;;  %p897_p4 = scmp.lt.s32.totalorder %s16_s10, %s16_s10 }
   0x8   :  { %p893_p3 = scmp.ne.s32.totalorder %s16_s10, %s892_s18  ;;  %p898_p5 = scmp.lt.s32.totalorder %s892_s18, %s892_s18 }
   0xa   :  { %p899_p6 = por %p898_p5, %p897_p4 }
   0xc   :  { %p900_p7 = pnand %p899_p6, %p893_p3 }
   0xe   :  { %903 = shalt.err (!%p900_p7)
}
   0xf   :  { %s907_s19 = smov 128   ;;  %s908_s20 = smov 8  }
  0x10   :  { %21 = dma.hbm_to_vmem [thread:$0]  %s1007_s1, 3328, %s16_s10, [#allocation3], %s907_s19, %s907_s19, %s908_s20  }
  0x11   :  { %904 = dma.done.wait [#allocation3], 3328  }
  0x12   :  { %905 = vsyncadd [#allocation3], 4294963968  ;;  %vm65_vm0 = vcmask 1045504   ;;  %vm52_vm1 = vcmask 48128   ;;  %v51_v0 = vld [vmem:[%s1006_s0] sm:$0x3f] }
  0x13   :  { %v25_v1 = vld [vmem:[#allocation2] sm:$0xff]  ;;  %v26_v2 = vld [vmem:[#allocation2 + $0x8] sm:$0xff]  ;;  %724 = vmatprep.subr.msk.mxu0 %vm65_vm0, %v51_v0  ;;  %v27_v3 = vld [vmem:[#allocation2 + $0x10] sm:$0xff]  ;;  %v909_v5 = vmov 0.0|0.0   ;;  %vm910_vm2 = vmmov 0   ;;  %v911_v6 = vmov 0.0  }
  0x14   :  { %726 = vmatprep.mubr.msk.f32.mxu0 %vm52_vm1, %v25_v1  ;;  %725 = vmatpush3.msk.msra.mxu0 %vm65_vm0, %v51_v0  ;;  %v28_v4 = vld [vmem:[#allocation2 + $0x18] sm:$0x7f]  ;;  %vm192_vm3 = vcmask 1046528   ;;  %vm912_vm4 = vmmov 1   ;;  %v29_v17 = vld [vmem:[#allocation2 + $0x20] sm:$0xff]  ;;  %vm158_vm6 = vcmask 252928  }
  0x15   :  { %727 = vmatmul.mubr.msk.f32.vlgmr.msra.gmra.mrb[0].mxu0 %vm52_vm1, %v26_v2  ;;  %834 = vmatprep.subr.bf16.mxu1 %v909_v5  ;;  %vm839_vm5 = vmpackc.low %vm192_vm3, %vm912_vm4  ;;  %v30_v18 = vld [vmem:[#allocation2 + $0x28] sm:$0xff]  ;;  %v31_v19 = vld [vmem:[#allocation2 + $0x30] sm:$0xff]  ;;  %vm327_vm7 = vcmask 662528   ;;  %vm346_vm8 = vcmask 1040384   ;;  %vm451_vm10 = vcmask 334848   ;;  %vm547_vm11 = vcmask 171008  }
  0x16   :  { %729 = vmatprep.mubr.msk.f32.mxu0 %vm52_vm1, %v27_v3  ;;  %740 = vmatprep.mubr.msk.f32.mxu1 %vm910_vm2, %v911_v6  ;;  %v32_v20 = vld [vmem:[#allocation2 + $0x38] sm:$0xff]  ;;  %v33_v21 = vld [vmem:[#allocation2 + $0x40] sm:$0xff]  ;;  %v34_v22 = vld [vmem:[#allocation2 + $0x48] sm:$0xff]  ;;  %vm554_vm12 = vcmask 1044480   ;;  %vm635_vm13 = vcmask 9216   ;;  %vm633_vm14 = vcmask 15360  }
  0x17   :  { %v35_v23 = vld [vmem:[#allocation2 + $0x50] sm:$0xff]  ;;  %v36_v24 = vld [vmem:[#allocation2 + $0x58] sm:$0xff]  ;;  %v37_v25 = vld [vmem:[#allocation2 + $0x60] sm:$0xff] }
  0x18   :  { %v38_v26 = vld [vmem:[#allocation2 + $0x68] sm:$0xff]  ;;  %v39_v27 = vld [vmem:[#allocation2 + $0x70] sm:$0x1]  ;;  %v40_v28 = vld [vmem:[#allocation2 + $0x78] sm:$0xff] }
  0x19   :  { %730 = vmatmul.mubr.msk.f32.gmra.mrb[2].mxu0 %vm52_vm1, %v28_v4  ;;  %v41_v3 = vld [vmem:[#allocation2 + $0x80] sm:$0xff]  ;;  %v42_v4 = vld [vmem:[#allocation2 + $0x88] sm:$0xff]  ;;  %vm869_vm9 = vmpackc.low %vm346_vm8, %vm912_vm4 }
  0x1a   :  { %795 = vmatprep.mubr.msk.f32.mxu0 %vm327_vm7, %v40_v28  ;;  %v49_v28 = vld [vmem:[#allocation2 + $0xc0] sm:$0xff] }
  0xe8   :  { %v728_v7 = vpop.f32.mrb[0].mxu0 }
  0xe9   :  { %v155_v8 = vmax.f32 %v728_v7, 0.0  ;;  %v135_v9 = vpop.f32.mrb[1].mxu0  ;;  %v43_v7 = vld [vmem:[#allocation2 + $0x90] sm:$0xff] }
  0xea   :  { %v154_v10 = vmax.f32 %v135_v9, 0.0  ;;  %v45_v9 = vld [vmem:[#allocation2 + $0xa0] sm:$0x1] }
  0xec   :  { %v731_v11 = vpop.f32.mrb[2].mxu0  ;;  %v835_v12 = vpack.c.bf16 %v155_v8, %v154_v10  ;;  %v44_v8 = vld [vmem:[#allocation2 + $0x98] sm:$0xff] }
  0xed   :  { %v157_v13 = vmax.f32 %v731_v11, 0.0  ;;  %v145_v14 = vpop.f32.mrb[3].mxu0 }
  0xee   :  { %v156_v15 = vmax.f32 %v145_v14, 0.0  ;;  %836 = vmatpush3.bf16.msra.mxu1 %v835_v12 }
  0xef   :  { %837 = vmatprep.subr.bf16.mxu1 %v909_v5 }
  0xf0   :  { %v838_v16 = vpack.c.bf16 %v157_v13, %v156_v15 }
  0xf2   :  { %840 = vmatpush3.bf16.msk.msra.mxu1 %vm839_vm5, %v838_v16 }
  0xf5   :  { %741 = vmatmul.mubr.msk.f32.vlgmr.msra.gmra.mrb[0].mxu1 %vm158_vm6, %v29_v17 }
  0xf6   :  { %743 = vmatprep.mubr.msk.f32.mxu1 %vm910_vm2, %v911_v6 }
  0xf9   :  { %744 = vmatmul.mubr.msk.f32.gmra.mrb[2].mxu1 %vm158_vm6, %v30_v18 }
  0xfa   :  { %746 = vmatprep.mubr.msk.f32.mxu1 %vm910_vm2, %v911_v6 }
  0xfd   :  { %747 = vmatmul.mubr.msk.f32.gmra.mrb[4].mxu1 %vm158_vm6, %v31_v19 }
  0xfe   :  { %749 = vmatprep.mubr.msk.f32.mxu1 %vm910_vm2, %v911_v6 }
 0x101   :  { %750 = vmatmul.mubr.msk.f32.gmra.mrb[6].mxu1 %vm158_vm6, %v32_v20 }
 0x102   :  { %752 = vmatprep.mubr.msk.f32.mxu1 %vm910_vm2, %v911_v6 }
 0x105   :  { %753 = vmatmul.mubr.msk.f32.gmra.mrb[8].mxu1 %vm158_vm6, %v33_v21 }
 0x106   :  { %755 = vmatprep.mubr.msk.f32.mxu1 %vm910_vm2, %v911_v6 }
 0x109   :  { %756 = vmatmul.mubr.msk.f32.gmra.mrb[10].mxu1 %vm158_vm6, %v34_v22 }
 0x10a   :  { %758 = vmatprep.mubr.msk.f32.mxu1 %vm910_vm2, %v911_v6 }
 0x10d   :  { %759 = vmatmul.mubr.msk.f32.gmra.mrb[12].mxu1 %vm158_vm6, %v35_v23 }
 0x10e   :  { %761 = vmatprep.mubr.msk.f32.mxu1 %vm910_vm2, %v911_v6 }
 0x111   :  { %762 = vmatmul.mubr.msk.f32.gmra.mrb[14].mxu1 %vm158_vm6, %v36_v24 }
 0x112   :  { %764 = vmatprep.mubr.msk.f32.mxu1 %vm910_vm2, %v911_v6 }
 0x115   :  { %765 = vmatmul.mubr.msk.f32.gmra.mrb[16].mxu1 %vm158_vm6, %v37_v25  ;;  %v46_v25 = vld [vmem:[#allocation2 + $0xa8] sm:$0xff] }
 0x116   :  { %767 = vmatprep.mubr.msk.f32.mxu1 %vm910_vm2, %v911_v6 }
 0x119   :  { %768 = vmatmul.mubr.msk.f32.gmra.mrb[18].mxu1 %vm158_vm6, %v38_v26  ;;  %v47_v26 = vld [vmem:[#allocation2 + $0xb0] sm:$0xff] }
 0x11a   :  { %770 = vmatprep.mubr.msk.f32.mxu1 %vm910_vm2, %v911_v6 }
 0x11d   :  { %771 = vmatmul.mubr.msk.f32.gmra.mrb[20].mxu1 %vm158_vm6, %v39_v27  ;;  %v48_v27 = vld [vmem:[#allocation2 + $0xb8] sm:$0x1f] }
 0x1c8   :  { %v262_v29 = vpop.f32.mrb[0].mxu1 }
 0x1c9   :  { %v742_v30 = vpop.f32.mrb[1].mxu1  ;;  %v316_v32 = vmax.f32 %v262_v29, 0.0 }
 0x1cc   :  { %v267_v31 = vpop.f32.mrb[2].mxu1 }
 0x1cd   :  { %v317_v33 = vmax.f32 %v267_v31, 0.0  ;;  %v745_v34 = vpop.f32.mrb[3].mxu1 }
 0x1cf   :  { %v841_v35 = vpack.c.bf16 %v317_v33, %v316_v32 }
 0x1d0   :  { %v272_v36 = vpop.f32.mrb[4].mxu1 }
 0x1d1   :  { %v748_v37 = vpop.f32.mrb[5].mxu1  ;;  %842 = vmatprep.subr.bf16.mxu0 %v841_v35  ;;  %v318_v39 = vmax.f32 %v272_v36, 0.0 }
 0x1d2   :  { %844 = vmatpush3.bf16.msra.mxu0 %v841_v35 }
 0x1d4   :  { %v277_v38 = vpop.f32.mrb[6].mxu1 }
 0x1d5   :  { %v319_v40 = vmax.f32 %v277_v38, 0.0  ;;  %v751_v41 = vpop.f32.mrb[7].mxu1 }
 0x1d7   :  { %v845_v42 = vpack.c.bf16 %v319_v40, %v318_v39 }
 0x1d8   :  { %v282_v43 = vpop.f32.mrb[8].mxu1 }
 0x1d9   :  { %v754_v44 = vpop.f32.mrb[9].mxu1  ;;  %846 = vmatprep.subr.bf16.mxu0 %v845_v42  ;;  %v320_v46 = vmax.f32 %v282_v43, 0.0 }
 0x1da   :  { %848 = vmatpush3.bf16.msra.mxu0 %v845_v42 }
 0x1dc   :  { %v287_v45 = vpop.f32.mrb[10].mxu1 }
 0x1dd   :  { %v321_v47 = vmax.f32 %v287_v45, 0.0  ;;  %v757_v48 = vpop.f32.mrb[11].mxu1 }
 0x1df   :  { %v849_v49 = vpack.c.bf16 %v321_v47, %v320_v46 }
 0x1e0   :  { %v292_v50 = vpop.f32.mrb[12].mxu1 }
 0x1e1   :  { %v760_v51 = vpop.f32.mrb[13].mxu1  ;;  %850 = vmatprep.subr.bf16.mxu0 %v849_v49  ;;  %v322_v53 = vmax.f32 %v292_v50, 0.0 }
 0x1e2   :  { %852 = vmatpush3.bf16.msra.mxu0 %v849_v49 }
 0x1e4   :  { %v297_v52 = vpop.f32.mrb[14].mxu1 }
 0x1e5   :  { %v323_v54 = vmax.f32 %v297_v52, 0.0  ;;  %v763_v55 = vpop.f32.mrb[15].mxu1 }
 0x1e7   :  { %v853_v56 = vpack.c.bf16 %v323_v54, %v322_v53 }
 0x1e8   :  { %v302_v57 = vpop.f32.mrb[16].mxu1 }
 0x1e9   :  { %v766_v58 = vpop.f32.mrb[17].mxu1  ;;  %854 = vmatprep.subr.bf16.mxu0 %v853_v56  ;;  %v324_v60 = vmax.f32 %v302_v57, 0.0 }
 0x1ea   :  { %856 = vmatpush3.bf16.msra.mxu0 %v853_v56 }
 0x1ec   :  { %v307_v59 = vpop.f32.mrb[18].mxu1 }
 0x1ed   :  { %v325_v61 = vmax.f32 %v307_v59, 0.0  ;;  %v769_v62 = vpop.f32.mrb[19].mxu1 }
 0x1ef   :  { %v857_v63 = vpack.c.bf16 %v325_v61, %v324_v60 }
 0x1f0   :  { %v312_v0 = vpop.f32.mrb[20].mxu1 }
 0x1f1   :  { %v326_v1 = vmax.f32 %v312_v0, 0.0  ;;  %858 = vmatprep.subr.bf16.mxu0 %v857_v63  ;;  %v772_v2 = vpop.f32.mrb[21].mxu1 }
 0x1f2   :  { %860 = vmatpush3.bf16.msra.mxu0 %v857_v63 }
 0x1f3   :  { %793 = vmatprep.subr.msk.mxu0 %vm346_vm8, %v326_v1 }
 0x1f6   :  { %794 = vmatpush3.msk.msra.mxu0 %vm346_vm8, %v326_v1 }
 0x1f7   :  { %796 = vmatmul.mubr.msk.f32.vlgmr.msra.gmra.mrb[4].mxu0 %vm327_vm7, %v41_v3  ;;  %861 = vmatprep.subr.bf16.mxu0 %v909_v5 }
 0x1f8   :  { %798 = vmatprep.mubr.msk.f32.mxu0 %vm327_vm7, %v42_v4 }
 0x1fb   :  { %799 = vmatmul.mubr.msk.f32.gmra.mrb[6].mxu0 %vm327_vm7, %v43_v7 }
 0x1fc   :  { %801 = vmatprep.mubr.msk.f32.mxu0 %vm327_vm7, %v44_v8 }
 0x1ff   :  { %802 = vmatmul.mubr.msk.f32.gmra.mrb[8].mxu0 %vm327_vm7, %v45_v9 }
 0x200   :  { %816 = vmatprep.mubr.msk.f32.mxu0 %vm910_vm2, %v911_v6 }
 0x2ca   :  { %v797_v10 = vpop.f32.mrb[4].mxu0 }
 0x2cb   :  { %v446_v11 = vmax.f32 %v797_v10, 0.0  ;;  %v416_v12 = vpop.f32.mrb[5].mxu0 }
 0x2cc   :  { %v445_v13 = vmax.f32 %v416_v12, 0.0 }
 0x2ce   :  { %v862_v14 = vpack.c.bf16 %v446_v11, %v445_v13  ;;  %v800_v15 = vpop.f32.mrb[6].mxu0 }
 0x2cf   :  { %v448_v16 = vmax.f32 %v800_v15, 0.0  ;;  %v426_v17 = vpop.f32.mrb[7].mxu0 }
 0x2d0   :  { %v447_v18 = vmax.f32 %v426_v17, 0.0  ;;  %863 = vmatpush3.bf16.msra.mxu0 %v862_v14 }
 0x2d1   :  { %864 = vmatprep.subr.bf16.mxu0 %v909_v5 }
 0x2d2   :  { %v865_v19 = vpack.c.bf16 %v448_v16, %v447_v18  ;;  %v803_v20 = vpop.f32.mrb[8].mxu0 }
 0x2d3   :  { %v450_v21 = vmax.f32 %v803_v20, 0.0  ;;  %v436_v22 = vpop.f32.mrb[9].mxu0 }
 0x2d4   :  { %v449_v23 = vmax.f32 %v436_v22, 0.0  ;;  %866 = vmatpush3.bf16.msra.mxu0 %v865_v19 }
 0x2d5   :  { %867 = vmatprep.subr.bf16.mxu0 %v909_v5 }
 0x2d6   :  { %v868_v24 = vpack.c.bf16 %v450_v21, %v449_v23 }
 0x2d8   :  { %870 = vmatpush3.bf16.msk.msra.mxu0 %vm869_vm9, %v868_v24 }
 0x2db   :  { %817 = vmatmul.mubr.msk.f32.vlgmr.msra.gmra.mrb[10].mxu0 %vm451_vm10, %v46_v25 }
 0x2dc   :  { %819 = vmatprep.mubr.msk.f32.mxu0 %vm910_vm2, %v911_v6 }
 0x2df   :  { %820 = vmatmul.mubr.msk.f32.gmra.mrb[12].mxu0 %vm451_vm10, %v47_v26 }
 0x2e0   :  { %822 = vmatprep.mubr.msk.f32.mxu0 %vm910_vm2, %v911_v6  ;;  %v50_v6 = vld [vmem:[#allocation2 + $0xc8] sm:$0x3] }
 0x2e3   :  { %823 = vmatmul.mubr.msk.f32.gmra.mrb[14].mxu0 %vm451_vm10, %v48_v27 }
 0x2e4   :  { %831 = vmatprep.mubr.msk.f32.mxu0 %vm547_vm11, %v49_v28 }
 0x3ae   :  { %v530_v5 = vpop.f32.mrb[10].mxu0 }
 0x3af   :  { %v818_v29 = vpop.f32.mrb[11].mxu0  ;;  %v544_v31 = vmax.f32 %v530_v5, 0.0 }
 0x3b2   :  { %v535_v30 = vpop.f32.mrb[12].mxu0 }
 0x3b3   :  { %v545_v32 = vmax.f32 %v535_v30, 0.0  ;;  %v821_v33 = vpop.f32.mrb[13].mxu0 }
 0x3b5   :  { %v871_v34 = vpack.c.bf16 %v545_v32, %v544_v31 }
 0x3b6   :  { %v540_v35 = vpop.f32.mrb[14].mxu0 }
 0x3b7   :  { %872 = vmatprep.subr.bf16.mxu0 %v871_v34  ;;  %v546_v36 = vmax.f32 %v540_v35, 0.0  ;;  %v824_v37 = vpop.f32.mrb[15].mxu0 }
 0x3b8   :  { %874 = vmatpush3.bf16.msra.mxu0 %v871_v34 }
 0x3b9   :  { %829 = vmatprep.subr.msk.mxu0 %vm554_vm12, %v546_v36 }
 0x3bc   :  { %830 = vmatpush3.msk.msra.mxu0 %vm554_vm12, %v546_v36 }
 0x3bd   :  { %832 = vmatmul.mubr.msk.f32.vlgmr.msra.gmra.mrb[16].mxu0 %vm547_vm11, %v50_v6 }
 0x490   :  { %v833_v38 = vpop.f32.mrb[16].mxu0 }
 0x491   :  { %636 = vst.msk [vmem:[%s1008_s2 + $0x8] sm:$0x3] %vm635_vm13, %v833_v38  ;;  %v624_v39 = vpop.f32.mrb[17].mxu0 }
 0x492   :  { %634 = vst.msk [vmem:[%s1008_s2] sm:$0xff] %vm633_vm14, %v624_v39 }
 0x493   :  { %641 = vsyncpa [#allocation3], 1 }

</bundles_post_ra>
